<compile_context>
chip_gen: v5e
topology: v5e:2x2
jax: 0.10.0
libtpu: 0.0.40
codegen_flags: <defaults>
</compile_context>

<pallas_src>
import jax
import jax.numpy as jnp
from jax import lax
from jax.experimental import pallas as pl
from jax.experimental.pallas import tpu as pltpu

BN_EPS = 1e-5

# Double-buffered block budget / requested scoped-VMEM limit (bytes).
_VMEM_BLOCK_BUDGET = 24 << 20
_VMEM_LIMIT_FLOOR = 32 << 20
_VMEM_LIMIT_CEIL = 56 << 20          # stay under v7x's 64 MiB physical VMEM
_FAST_PATH_BYTES = 4 << 20           # whole problem <= this -> single grid step


# --------------------------------------------------------------------------- #
# Kernels
# --------------------------------------------------------------------------- #
def feature_fused_kernel(s1_ref, s2_ref, gamma_ref, beta_ref, out_ref):
    """Single-step fast path: whole problem resident in VMEM, one invocation."""
    a = s1_ref[...].astype(jnp.float32)          # (B, size)
    b = s2_ref[...].astype(jnp.float32)          # (B, size)
    size = a.shape[1]
    inv_n = 1.0 / a.shape[0]
    # BatchNorm1d training-mode forward: per-feature batch mean & biased var,
    # centered (two-pass) variance, f32 accumulation.
    for g, x in enumerate((a, b, a - b, a * b)):
        mean = jnp.sum(x, axis=0, keepdims=True) * inv_n
        xc = x - mean
        var = jnp.sum(xc * xc, axis=0, keepdims=True) * inv_n
        scale = lax.rsqrt(var + BN_EPS) * gamma_ref[:, g * size:(g + 1) * size]
        shift = beta_ref[:, g * size:(g + 1) * size]
        # TODO(synk): nn.Dropout applied as identity (eval-mode); training-mode
        # RNG dropout mask and BatchNorm running-stat updates are not emitted.
        out_ref[:, g * size:(g + 1) * size] = (xc * scale + shift).astype(out_ref.dtype)


def feature_tiled_kernel(s1_ref, s2_ref, gamma_ref, beta_ref, out_ref):
    """Tiled path: grid=(n_ft, 4); group axis innermost so s1/s2 DMAs hoist."""
    g = pl.program_id(1)                         # feature group 0..3
    a = s1_ref[...].astype(jnp.float32)          # (B, f_tile) — fetched once per t
    b = s2_ref[...].astype(jnp.float32)          # (B, f_tile)

    # Scalar-branched select: only the needed branch executes (scf.index_switch).
    x = lax.switch(g, (lambda: a,
                       lambda: b,
                       lambda: a - b,
                       lambda: a * b))

    inv_n = 1.0 / x.shape[0]
    mean = jnp.sum(x, axis=0, keepdims=True) * inv_n          # (1, f_tile)
    xc = x - mean
    var = jnp.sum(xc * xc, axis=0, keepdims=True) * inv_n     # centered, f32
    scale = lax.rsqrt(var + BN_EPS) * gamma_ref[...]          # (1, f_tile)
    # TODO(synk): Dropout identity (eval-mode); no running-stat momentum update.
    out_ref[...] = (xc * scale + beta_ref[...]).astype(out_ref.dtype)


# --------------------------------------------------------------------------- #
# Tiling plan
# --------------------------------------------------------------------------- #
def _plan_tiles(batch, size):
    """Pick a lane-dense feature tile and the scoped-VMEM limit to request."""
    def live_bytes(ft):
        # double-buffered s1 + s2 + out blocks (B, ft) and gamma/beta (1, ft)
        return 2 * (3 * batch * ft + 2 * ft) * 4

    if size % 128 != 0:
        # TODO(synk): pad the feature dim to a 128-multiple for lane-dense
        # stores; for now fall back to one whole-size tile per group.
        f_tile = size
    else:
        f_tile = 128
        while (size % (2 * f_tile) == 0
               and 2 * f_tile <= 2048
               and live_bytes(2 * f_tile) <= _VMEM_BLOCK_BUDGET):
            f_tile *= 2

    # TODO(synk): very large batches (blocks > ~48 MiB even at f_tile=128) need
    # a two-pass batch-tiled BN (sum/sumsq accumulators + pl.when finalize).
    vmem_limit = max(_VMEM_LIMIT_FLOOR,
                     min(live_bytes(f_tile) + (8 << 20), _VMEM_LIMIT_CEIL))
    return f_tile, vmem_limit


# --------------------------------------------------------------------------- #
# Wrapper
# --------------------------------------------------------------------------- #
def feature_forward(s1, s2, gamma, beta, force_tiled=False):
    """Fused Feature forward.

    s1, s2      : (B, size)
    gamma, beta : (4*size,) or (1, 4*size) BatchNorm1d affine params
    returns     : (B, 4*size) = BN(concat([s1, s2, s1-s2, s1*s2], dim=1))
    """
    B, size = s1.shape
    F = 4 * size
    gamma = jnp.asarray(gamma, jnp.float32).reshape(1, F)
    beta = jnp.asarray(beta, jnp.float32).reshape(1, F)

    total_bytes = (2 * B * size + B * F + 2 * F) * 4
    if total_bytes <= _FAST_PATH_BYTES and not force_tiled:
        # Single-step fast path: no per-step pipeline overhead, inputs read once.
        return pl.pallas_call(
            feature_fused_kernel,
            out_shape=jax.ShapeDtypeStruct((B, F), s1.dtype),
            grid=(1,),
            in_specs=[
                pl.BlockSpec((B, size), lambda i: (0, 0)),
                pl.BlockSpec((B, size), lambda i: (0, 0)),
                pl.BlockSpec((1, F), lambda i: (0, 0)),
                pl.BlockSpec((1, F), lambda i: (0, 0)),
            ],
            out_specs=pl.BlockSpec((B, F), lambda i: (0, 0)),
            compiler_params=pltpu.CompilerParams(
                dimension_semantics=("arbitrary",),
                vmem_limit_bytes=_VMEM_LIMIT_FLOOR),
        )(s1, s2, gamma, beta)

    f_tile, vmem_limit = _plan_tiles(B, size)
    n_ft = size // f_tile
    grid = (n_ft, 4)  # (feature tile, group) — group innermost so input DMAs hoist

    return pl.pallas_call(
        feature_tiled_kernel,
        out_shape=jax.ShapeDtypeStruct((B, F), s1.dtype),
        grid=grid,
        in_specs=[
            pl.BlockSpec((B, f_tile), lambda t, g: (0, t)),        # invariant in g
            pl.BlockSpec((B, f_tile), lambda t, g: (0, t)),        # -> fetched once
            pl.BlockSpec((1, f_tile), lambda t, g: (0, g * n_ft + t)),
            pl.BlockSpec((1, f_tile), lambda t, g: (0, g * n_ft + t)),
        ],
        out_specs=pl.BlockSpec((B, f_tile), lambda t, g: (0, g * n_ft + t)),
        compiler_params=pltpu.CompilerParams(
            dimension_semantics=("parallel", "arbitrary"),
            vmem_limit_bytes=vmem_limit),
    )(s1, s2, gamma, beta)


# --------------------------------------------------------------------------- #
# Reference & test
# --------------------------------------------------------------------------- #
def feature_reference(s1, s2, gamma, beta):
    F = 4 * s1.shape[1]
    gamma = gamma.reshape(1, F)
    beta = beta.reshape(1, F)
    feats = jnp.concatenate([s1, s2, s1 - s2, s1 * s2], axis=1)
    mean = jnp.mean(feats, axis=0, keepdims=True)
    var = jnp.mean((feats - mean) ** 2, axis=0, keepdims=True)
    return (feats - mean) * lax.rsqrt(var + BN_EPS) * gamma + beta


if __name__ == "__main__":
    # Feature(size=128, dropout=0.1): lane-dense 128-wide feature groups.
    B, SIZE = 8, 128
    F = 4 * SIZE

    key = jax.random.PRNGKey(0)
    k1, k2, k3, k4 = jax.random.split(key, 4)
    s1 = jax.random.normal(k1, (B, SIZE), dtype=jnp.float32)
    s2 = jax.random.normal(k2, (B, SIZE), dtype=jnp.float32)
    # BatchNorm1d default init is weight=1, bias=0; perturbed so the affine
    # path is actually exercised by the correctness check.
    gamma = 1.0 + 0.1 * jax.random.normal(k3, (F,), dtype=jnp.float32)
    beta = 0.1 * jax.random.normal(k4, (F,), dtype=jnp.float32)

    ref = feature_reference(s1, s2, gamma, beta)

    # Fast path (single grid step).
    out = jax.block_until_ready(feature_forward(s1, s2, gamma, beta))
    assert out.shape == (B, F)
    assert jnp.allclose(out, ref, atol=1e-4, rtol=1e-4), "fast path mismatch"

    # Tiled path (grid=(n_ft, 4), hoisted input DMAs) exercised as well.
    out_t = jax.block_until_ready(
        feature_forward(s1, s2, gamma, beta, force_tiled=True))
    assert jnp.allclose(out_t, ref, atol=1e-4, rtol=1e-4), "tiled path mismatch"

    print("KERNEL_OK")
</pallas_src>

<mosaic_0001>
module attributes {stable_mosaic.version = 11 : i64} {
  func.func @feature_fused_kernel(%arg0: i32, %arg1: memref<8x128xf32, #tpu.memory_space<vmem>>, %arg2: memref<8x128xf32, #tpu.memory_space<vmem>>, %arg3: memref<1x512xf32, #tpu.memory_space<vmem>>, %arg4: memref<1x512xf32, #tpu.memory_space<vmem>>, %arg5: memref<8x512xf32, #tpu.memory_space<vmem>>) attributes {dimension_semantics = [#tpu.dimension_semantics<arbitrary>], iteration_bounds = array<i64: 1>, scalar_prefetch = 0 : i64, scratch_operands = 0 : i64, tpu.core_type = #tpu.core_type<tc>, window_params = [{pipeline_mode = #tpu.pipeline_mode<synchronous>, transform_indices = @transform_0, window_bounds = array<i64: 8, 128>}, {pipeline_mode = #tpu.pipeline_mode<synchronous>, transform_indices = @transform_1, window_bounds = array<i64: 8, 128>}, {pipeline_mode = #tpu.pipeline_mode<synchronous>, transform_indices = @transform_2, window_bounds = array<i64: 1, 512>}, {pipeline_mode = #tpu.pipeline_mode<synchronous>, transform_indices = @transform_3, window_bounds = array<i64: 1, 512>}, {pipeline_mode = #tpu.pipeline_mode<synchronous>, transform_indices = @transform_4, window_bounds = array<i64: 8, 512>}]} {
    %c0 = arith.constant 0 : index
    %c0_0 = arith.constant 0 : index
    %0 = vector.load %arg1[%c0, %c0_0] : memref<8x128xf32, #tpu.memory_space<vmem>>, vector<8x128xf32>
    %c0_1 = arith.constant 0 : index
    %c0_2 = arith.constant 0 : index
    %1 = vector.load %arg2[%c0_1, %c0_2] : memref<8x128xf32, #tpu.memory_space<vmem>>, vector<8x128xf32>
    %2 = arith.subf %0, %1 : vector<8x128xf32>
    %3 = arith.mulf %0, %1 : vector<8x128xf32>
    %cst = arith.constant dense<0.000000e+00> : vector<128xf32>
    %4 = vector.multi_reduction <add>, %0, %cst [0] : vector<8x128xf32> to vector<128xf32>
    %5 = vector.shape_cast %4 : vector<128xf32> to vector<1x128xf32>
    %cst_3 = arith.constant 1.250000e-01 : f32
    %6 = vector.broadcast %cst_3 : f32 to vector<1x128xf32>
    %7 = arith.mulf %5, %6 : vector<1x128xf32>
    %8 = vector.broadcast %7 : vector<1x128xf32> to vector<8x128xf32>
    %9 = arith.subf %0, %8 : vector<8x128xf32>
    %10 = arith.mulf %9, %9 : vector<8x128xf32>
    %cst_4 = arith.constant dense<0.000000e+00> : vector<128xf32>
    %11 = vector.multi_reduction <add>, %10, %cst_4 [0] : vector<8x128xf32> to vector<128xf32>
    %12 = vector.shape_cast %11 : vector<128xf32> to vector<1x128xf32>
    %cst_5 = arith.constant 1.250000e-01 : f32
    %13 = vector.broadcast %cst_5 : f32 to vector<1x128xf32>
    %14 = arith.mulf %12, %13 : vector<1x128xf32>
    %cst_6 = arith.constant 9.99999974E-6 : f32
    %15 = vector.broadcast %cst_6 : f32 to vector<1x128xf32>
    %16 = arith.addf %14, %15 : vector<1x128xf32>
    %17 = math.rsqrt %16 : vector<1x128xf32>
    %c0_7 = arith.constant 0 : index
    %c0_8 = arith.constant 0 : index
    %18 = vector.load %arg3[%c0_7, %c0_8] : memref<1x512xf32, #tpu.memory_space<vmem>>, vector<1x128xf32>
    %19 = arith.mulf %17, %18 : vector<1x128xf32>
    %c0_9 = arith.constant 0 : index
    %c0_10 = arith.constant 0 : index
    %20 = vector.load %arg4[%c0_9, %c0_10] : memref<1x512xf32, #tpu.memory_space<vmem>>, vector<1x128xf32>
    %21 = vector.broadcast %19 : vector<1x128xf32> to vector<8x128xf32>
    %22 = arith.mulf %9, %21 : vector<8x128xf32>
    %23 = vector.broadcast %20 : vector<1x128xf32> to vector<8x128xf32>
    %24 = arith.addf %22, %23 : vector<8x128xf32>
    %c0_11 = arith.constant 0 : index
    %c0_12 = arith.constant 0 : index
    %25 = vector.load %arg5[%c0_11, %c0_12] : memref<8x512xf32, #tpu.memory_space<vmem>>, vector<8x128xf32>
    tpu.vector_store %arg5[%c0_11, %c0_12], %24 {strides = array<i32>} : memref<8x512xf32, #tpu.memory_space<vmem>>, vector<8x128xf32>,
    %cst_13 = arith.constant dense<0.000000e+00> : vector<128xf32>
    %26 = vector.multi_reduction <add>, %1, %cst_13 [0] : vector<8x128xf32> to vector<128xf32>
    %27 = vector.shape_cast %26 : vector<128xf32> to vector<1x128xf32>
    %cst_14 = arith.constant 1.250000e-01 : f32
    %28 = vector.broadcast %cst_14 : f32 to vector<1x128xf32>
    %29 = arith.mulf %27, %28 : vector<1x128xf32>
    %30 = vector.broadcast %29 : vector<1x128xf32> to vector<8x128xf32>
    %31 = arith.subf %1, %30 : vector<8x128xf32>
    %32 = arith.mulf %31, %31 : vector<8x128xf32>
    %cst_15 = arith.constant dense<0.000000e+00> : vector<128xf32>
    %33 = vector.multi_reduction <add>, %32, %cst_15 [0] : vector<8x128xf32> to vector<128xf32>
    %34 = vector.shape_cast %33 : vector<128xf32> to vector<1x128xf32>
    %cst_16 = arith.constant 1.250000e-01 : f32
    %35 = vector.broadcast %cst_16 : f32 to vector<1x128xf32>
    %36 = arith.mulf %34, %35 : vector<1x128xf32>
    %cst_17 = arith.constant 9.99999974E-6 : f32
    %37 = vector.broadcast %cst_17 : f32 to vector<1x128xf32>
    %38 = arith.addf %36, %37 : vector<1x128xf32>
    %39 = math.rsqrt %38 : vector<1x128xf32>
    %c0_18 = arith.constant 0 : index
    %c128 = arith.constant 128 : index
    %40 = vector.load %arg3[%c0_18, %c128] : memref<1x512xf32, #tpu.memory_space<vmem>>, vector<1x128xf32>
    %41 = arith.mulf %39, %40 : vector<1x128xf32>
    %c0_19 = arith.constant 0 : index
    %c128_20 = arith.constant 128 : index
    %42 = vector.load %arg4[%c0_19, %c128_20] : memref<1x512xf32, #tpu.memory_space<vmem>>, vector<1x128xf32>
    %43 = vector.broadcast %41 : vector<1x128xf32> to vector<8x128xf32>
    %44 = arith.mulf %31, %43 : vector<8x128xf32>
    %45 = vector.broadcast %42 : vector<1x128xf32> to vector<8x128xf32>
    %46 = arith.addf %44, %45 : vector<8x128xf32>
    %c0_21 = arith.constant 0 : index
    %c128_22 = arith.constant 128 : index
    %47 = vector.load %arg5[%c0_21, %c128_22] : memref<8x512xf32, #tpu.memory_space<vmem>>, vector<8x128xf32>
    tpu.vector_store %arg5[%c0_21, %c128_22], %46 {strides = array<i32>} : memref<8x512xf32, #tpu.memory_space<vmem>>, vector<8x128xf32>,
    %cst_23 = arith.constant dense<0.000000e+00> : vector<128xf32>
    %48 = vector.multi_reduction <add>, %2, %cst_23 [0] : vector<8x128xf32> to vector<128xf32>
    %49 = vector.shape_cast %48 : vector<128xf32> to vector<1x128xf32>
    %cst_24 = arith.constant 1.250000e-01 : f32
    %50 = vector.broadcast %cst_24 : f32 to vector<1x128xf32>
    %51 = arith.mulf %49, %50 : vector<1x128xf32>
    %52 = vector.broadcast %51 : vector<1x128xf32> to vector<8x128xf32>
    %53 = arith.subf %2, %52 : vector<8x128xf32>
    %54 = arith.mulf %53, %53 : vector<8x128xf32>
    %cst_25 = arith.constant dense<0.000000e+00> : vector<128xf32>
    %55 = vector.multi_reduction <add>, %54, %cst_25 [0] : vector<8x128xf32> to vector<128xf32>
    %56 = vector.shape_cast %55 : vector<128xf32> to vector<1x128xf32>
    %cst_26 = arith.constant 1.250000e-01 : f32
    %57 = vector.broadcast %cst_26 : f32 to vector<1x128xf32>
    %58 = arith.mulf %56, %57 : vector<1x128xf32>
    %cst_27 = arith.constant 9.99999974E-6 : f32
    %59 = vector.broadcast %cst_27 : f32 to vector<1x128xf32>
    %60 = arith.addf %58, %59 : vector<1x128xf32>
    %61 = math.rsqrt %60 : vector<1x128xf32>
    %c0_28 = arith.constant 0 : index
    %c256 = arith.constant 256 : index
    %62 = vector.load %arg3[%c0_28, %c256] : memref<1x512xf32, #tpu.memory_space<vmem>>, vector<1x128xf32>
    %63 = arith.mulf %61, %62 : vector<1x128xf32>
    %c0_29 = arith.constant 0 : index
    %c256_30 = arith.constant 256 : index
    %64 = vector.load %arg4[%c0_29, %c256_30] : memref<1x512xf32, #tpu.memory_space<vmem>>, vector<1x128xf32>
    %65 = vector.broadcast %63 : vector<1x128xf32> to vector<8x128xf32>
    %66 = arith.mulf %53, %65 : vector<8x128xf32>
    %67 = vector.broadcast %64 : vector<1x128xf32> to vector<8x128xf32>
    %68 = arith.addf %66, %67 : vector<8x128xf32>
    %c0_31 = arith.constant 0 : index
    %c256_32 = arith.constant 256 : index
    %69 = vector.load %arg5[%c0_31, %c256_32] : memref<8x512xf32, #tpu.memory_space<vmem>>, vector<8x128xf32>
    tpu.vector_store %arg5[%c0_31, %c256_32], %68 {strides = array<i32>} : memref<8x512xf32, #tpu.memory_space<vmem>>, vector<8x128xf32>,
    %cst_33 = arith.constant dense<0.000000e+00> : vector<128xf32>
    %70 = vector.multi_reduction <add>, %3, %cst_33 [0] : vector<8x128xf32> to vector<128xf32>
    %71 = vector.shape_cast %70 : vector<128xf32> to vector<1x128xf32>
    %cst_34 = arith.constant 1.250000e-01 : f32
    %72 = vector.broadcast %cst_34 : f32 to vector<1x128xf32>
    %73 = arith.mulf %71, %72 : vector<1x128xf32>
    %74 = vector.broadcast %73 : vector<1x128xf32> to vector<8x128xf32>
    %75 = arith.subf %3, %74 : vector<8x128xf32>
    %76 = arith.mulf %75, %75 : vector<8x128xf32>
    %cst_35 = arith.constant dense<0.000000e+00> : vector<128xf32>
    %77 = vector.multi_reduction <add>, %76, %cst_35 [0] : vector<8x128xf32> to vector<128xf32>
    %78 = vector.shape_cast %77 : vector<128xf32> to vector<1x128xf32>
    %cst_36 = arith.constant 1.250000e-01 : f32
    %79 = vector.broadcast %cst_36 : f32 to vector<1x128xf32>
    %80 = arith.mulf %78, %79 : vector<1x128xf32>
    %cst_37 = arith.constant 9.99999974E-6 : f32
    %81 = vector.broadcast %cst_37 : f32 to vector<1x128xf32>
    %82 = arith.addf %80, %81 : vector<1x128xf32>
    %83 = math.rsqrt %82 : vector<1x128xf32>
    %c0_38 = arith.constant 0 : index
    %c384 = arith.constant 384 : index
    %84 = vector.load %arg3[%c0_38, %c384] : memref<1x512xf32, #tpu.memory_space<vmem>>, vector<1x128xf32>
    %85 = arith.mulf %83, %84 : vector<1x128xf32>
    %c0_39 = arith.constant 0 : index
    %c384_40 = arith.constant 384 : index
    %86 = vector.load %arg4[%c0_39, %c384_40] : memref<1x512xf32, #tpu.memory_space<vmem>>, vector<1x128xf32>
    %87 = vector.broadcast %85 : vector<1x128xf32> to vector<8x128xf32>
    %88 = arith.mulf %75, %87 : vector<8x128xf32>
    %89 = vector.broadcast %86 : vector<1x128xf32> to vector<8x128xf32>
    %90 = arith.addf %88, %89 : vector<8x128xf32>
    %c0_41 = arith.constant 0 : index
    %c384_42 = arith.constant 384 : index
    %91 = vector.load %arg5[%c0_41, %c384_42] : memref<8x512xf32, #tpu.memory_space<vmem>>, vector<8x128xf32>
    tpu.vector_store %arg5[%c0_41, %c384_42], %90 {strides = array<i32>} : memref<8x512xf32, #tpu.memory_space<vmem>>, vector<8x128xf32>,
    return
  }
  func.func @transform_0(%arg0: i32) -> (i32, i32) {
    %c0_i32 = arith.constant 0 : i32
    %c0_i32_0 = arith.constant 0 : i32
    %c0_i32_1 = arith.constant 0 : i32
    return %c0_i32, %c0_i32_0 : i32, i32
  }
  func.func @transform_1(%arg0: i32) -> (i32, i32) {
    %c0_i32 = arith.constant 0 : i32
    %c0_i32_0 = arith.constant 0 : i32
    %c0_i32_1 = arith.constant 0 : i32
    return %c0_i32, %c0_i32_0 : i32, i32
  }
  func.func @transform_2(%arg0: i32) -> (i32, i32) {
    %c0_i32 = arith.constant 0 : i32
    %c0_i32_0 = arith.constant 0 : i32
    %c0_i32_1 = arith.constant 0 : i32
    return %c0_i32, %c0_i32_0 : i32, i32
  }
  func.func @transform_3(%arg0: i32) -> (i32, i32) {
    %c0_i32 = arith.constant 0 : i32
    %c0_i32_0 = arith.constant 0 : i32
    %c0_i32_1 = arith.constant 0 : i32
    return %c0_i32, %c0_i32_0 : i32, i32
  }
  func.func @transform_4(%arg0: i32) -> (i32, i32) {
    %c0_i32 = arith.constant 0 : i32
    %c0_i32_0 = arith.constant 0 : i32
    %c0_i32_1 = arith.constant 0 : i32
    return %c0_i32, %c0_i32_0 : i32, i32
  }
}

</mosaic_0001>

<bundles_post_ra>
// kernel: tpu_custom_call.1
= control target key start
LH: loop header
LB: loop body
LE: loop exit
PB: predicated region body
PF: predicated region fallthrough
CT: control target
= control target key end

     0   :  { %9 = vsyncpa [#allocation3], 0  ;;  %s460_s0 = inlined_call_operand.hbm [shape: f32[8,128], index: 0, kind: input, shape index: {}]   ;;  %s461_s1 = inlined_call_operand.hbm [shape: f32[8,128], index: 1, kind: input, shape index: {}]   ;;  %s462_s2 = inlined_call_operand.hbm [shape: f32[1,512], index: 2, kind: input, shape index: {}]   ;;  %s463_s3 = inlined_call_operand.hbm [shape: f32[1,512], index: 3, kind: input, shape index: {}]   ;;  %s464_s4 = inlined_call_operand.hbm [shape: f32[8,512], index: 4, kind: output, shape index: {}]  }
   0x1   :  { %10 = vsyncpa [#allocation6], 0 }
   0x2   :  { %11 = vsyncpa [#allocation9], 0  ;;  %s29_s17 = sshll.u32 %s461_s1, 4  ;;  %s30_s17 = int_to_ptr.hbm [resolvable:$true] %s29_s17 }
   0x3   :  { %12 = vsyncpa [#allocation4], 0  ;;  %s389_s18 = smov [#allocation5]   ;;  %s18_s22 = sshll.u32 %s460_s0, 4  ;;  %s19_s22 = int_to_ptr.hbm [resolvable:$true] %s18_s22 }
   0x4   :  { %s31_s19 = sshll.u32 %s389_s18, 4  ;;  %s390_s23 = smov [#allocation2]   ;;  %s32_s19 = int_to_ptr.vmem [resolvable:$true] %s31_s19 }
   0x5   :  { %34 = dma.hbm_to_vmem [thread:$0]  %s30_s17, 128, %s32_s19, [#allocation6]  }
   0x6   :  { %s20_s24 = sshll.u32 %s390_s23, 4  ;;  %s40_s27 = sshll.u32 %s462_s2, 4  ;;  %s21_s24 = int_to_ptr.vmem [resolvable:$true] %s20_s24  ;;  %s41_s27 = int_to_ptr.hbm [resolvable:$true] %s40_s27 }
   0x7   :  { %23 = dma.hbm_to_vmem [thread:$0]  %s19_s22, 128, %s21_s24, [#allocation3]  }
   0x8   :  { %s51_s29 = sshll.u32 %s463_s3, 4  ;;  %s391_s30 = smov [#allocation7]   ;;  %s52_s29 = int_to_ptr.hbm [resolvable:$true] %s51_s29 }
   0x9   :  { %s42_s5 = sshll.u32 %s391_s30, 4  ;;  %s392_s0 = smov [#allocation8]   ;;  %s43_s5 = int_to_ptr.vmem [resolvable:$true] %s42_s5 }
   0xa   :  { %45 = dma.hbm_to_vmem [thread:$0]  %s41_s27, 64, %s43_s5, [#allocation6]  }
   0xb   :  { %s53_s6 = sshll.u32 %s392_s0, 4  ;;  %s54_s6 = int_to_ptr.vmem [resolvable:$true] %s53_s6 }
   0xc   :  { %56 = dma.hbm_to_vmem [thread:$0]  %s52_s29, 64, %s54_s6, [#allocation9]  }
   0xd   :  { %381 = dma.done.wait [#allocation3], 128  }
   0xe   :  { %382 = vsyncadd [#allocation3], 4294967168 }
   0xf   :  { %383 = dma.done.wait [#allocation6], 192  }
  0x10   :  { %384 = vsyncadd [#allocation6], 4294967104 }
  0x11   :  { %385 = dma.done.wait [#allocation9], 64  }
  0x12   :  { %386 = vsyncadd [#allocation9], 4294967232  ;;  %v73_v0 = vld [vmem:[#allocation2] sm:$0xff]  ;;  %v74_v1 = vld [vmem:[#allocation5] sm:$0xff]  ;;  %s393_s2 = smov [#allocation10]   ;;  %s232_s9 = sshll.u32 %s464_s4, 4  ;;  %s233_s9 = int_to_ptr.hbm [resolvable:$true] %s232_s9 }
  0x13   :  { %v77_v2 = vrot.slane %v73_v0, 4  ;;  %v114_v3 = vrot.slane %v74_v1, 4  ;;  %v75_v4 = vsub.f32 %v73_v0, %v74_v1  ;;  %v76_v5 = vmul.f32 %v74_v1, %v73_v0  ;;  %s230_s3 = sshll.u32 %s393_s2, 4  ;;  %s231_s3 = int_to_ptr.vmem [resolvable:$true] %s230_s3 }
  0x15   :  { %v78_v6 = vadd.f32 %v77_v2, %v73_v0  ;;  %v115_v7 = vadd.f32 %v114_v3, %v74_v1  ;;  %v151_v8 = vrot.slane %v75_v4, 4  ;;  %v188_v9 = vrot.slane %v76_v5, 4 }
  0x17   :  { %v79_v10 = vrot.slane %v78_v6, 2  ;;  %v116_v11 = vrot.slane %v115_v7, 2  ;;  %v152_v12 = vadd.f32 %v151_v8, %v75_v4  ;;  %v189_v13 = vadd.f32 %v188_v9, %v76_v5 }
  0x19   :  { %v80_v14 = vadd.f32 %v79_v10, %v78_v6  ;;  %v117_v15 = vadd.f32 %v116_v11, %v115_v7  ;;  %v153_v16 = vrot.slane %v152_v12, 2  ;;  %v190_v17 = vrot.slane %v189_v13, 2 }
  0x1b   :  { %v81_v18 = vrot.slane %v80_v14, 1  ;;  %v118_v19 = vrot.slane %v117_v15, 1  ;;  %v154_v20 = vadd.f32 %v153_v16, %v152_v12  ;;  %v191_v21 = vadd.f32 %v190_v17, %v189_v13 }
  0x1d   :  { %v82_v22 = vadd.f32 %v81_v18, %v80_v14  ;;  %v119_v23 = vadd.f32 %v118_v19, %v117_v15  ;;  %v155_v24 = vrot.slane %v154_v20, 1  ;;  %v192_v25 = vrot.slane %v191_v21, 1 }
  0x1f   :  { %v83_v26 = vmul.f32 0.125, %v82_v22  ;;  %v120_v27 = vmul.f32 0.125, %v119_v23  ;;  %v156_v28 = vadd.f32 %v155_v24, %v154_v20  ;;  %v193_v29 = vadd.f32 %v192_v25, %v191_v21 }
  0x21   :  { %v431_v30 = vsub.f32 %v73_v0, %v83_v26  ;;  %v433_v31 = vsub.f32 %v74_v1, %v120_v27  ;;  %v157_v32 = vmul.f32 0.125, %v156_v28  ;;  %v194_v33 = vmul.f32 0.125, %v193_v29  ;;  %v104_v28 = vld [vmem:[#allocation7] sm:$0x1] }
  0x23   :  { %v85_v34 = vmul.f32 %v431_v30, %v431_v30  ;;  %v122_v35 = vmul.f32 %v433_v31, %v433_v31  ;;  %v439_v36 = vsub.f32 %v75_v4, %v157_v32  ;;  %v441_v37 = vsub.f32 %v76_v5, %v194_v33  ;;  %v141_v33 = vld [vmem:[#allocation7 + $0x1] sm:$0x1] }
  0x25   :  { %v86_v38 = vrot.slane %v85_v34, 4  ;;  %v123_v39 = vrot.slane %v122_v35, 4  ;;  %v159_v40 = vmul.f32 %v439_v36, %v439_v36  ;;  %v196_v41 = vmul.f32 %v441_v37, %v441_v37 }
  0x27   :  { %v87_v42 = vadd.f32 %v86_v38, %v85_v34  ;;  %v124_v43 = vadd.f32 %v123_v39, %v122_v35  ;;  %v160_v44 = vrot.slane %v159_v40, 4  ;;  %v197_v45 = vrot.slane %v196_v41, 4  ;;  %v178_v39 = vld [vmem:[#allocation7 + $0x2] sm:$0x1] }
  0x29   :  { %v88_v46 = vrot.slane %v87_v42, 2  ;;  %v125_v47 = vrot.slane %v124_v43, 2  ;;  %v161_v48 = vadd.f32 %v160_v44, %v159_v40  ;;  %v198_v49 = vadd.f32 %v197_v45, %v196_v41 }
  0x2b   :  { %v89_v50 = vadd.f32 %v88_v46, %v87_v42  ;;  %v126_v51 = vadd.f32 %v125_v47, %v124_v43  ;;  %v162_v52 = vrot.slane %v161_v48, 2  ;;  %v199_v53 = vrot.slane %v198_v49, 2  ;;  %v215_v43 = vld [vmem:[#allocation7 + $0x3] sm:$0x1]  ;;  %v249_v47 = vld [vmem:[#allocation8] ss:$0 sm:$0xff] }
  0x2d   :  { %v90_v54 = vrot.slane %v89_v50, 1  ;;  %v127_v55 = vrot.slane %v126_v51, 1  ;;  %v163_v56 = vadd.f32 %v162_v52, %v161_v48  ;;  %v200_v57 = vadd.f32 %v199_v53, %v198_v49 }
  0x2f   :  { %v91_v58 = vadd.f32 %v90_v54, %v89_v50  ;;  %v128_v59 = vadd.f32 %v127_v55, %v126_v51  ;;  %v164_v60 = vrot.slane %v163_v56, 1  ;;  %v201_v61 = vrot.slane %v200_v57, 1  ;;  %v250_v51 = vld [vmem:[#allocation8 + $0x1] ss:$0 sm:$0xff]  ;;  %v251_v55 = vld [vmem:[#allocation8 + $0x2] ss:$0 sm:$0xff] }
  0x31   :  { %v92_v62 = vmul.f32 0.125, %v91_v58  ;;  %v129_v63 = vmul.f32 0.125, %v128_v59  ;;  %v165_v0 = vadd.f32 %v164_v60, %v163_v56  ;;  %v202_v1 = vadd.f32 %v201_v61, %v200_v57  ;;  %v252_v58 = vld [vmem:[#allocation8 + $0x3] ss:$0 sm:$0xff] }
  0x33   :  { %v93_v2 = vadd.f32 1e-05, %v92_v62  ;;  %v130_v3 = vadd.f32 1e-05, %v129_v63  ;;  %v166_v4 = vmul.f32 0.125, %v165_v0  ;;  %v203_v5 = vmul.f32 0.125, %v202_v1 }
  0x35   :  { %253 = vrsqrt.f32 %v93_v2  ;;  %v167_v6 = vadd.f32 1e-05, %v166_v4  ;;  %v204_v7 = vadd.f32 1e-05, %v203_v5  ;;  %vm100_vm0 = vweird.f32 %v93_v2 }
  0x36   :  { %255 = vrsqrt.f32 %v130_v3  ;;  %vm137_vm2 = vweird.f32 %v130_v3 }
  0x37   :  { %257 = vrsqrt.f32 %v167_v6  ;;  %vm174_vm4 = vweird.f32 %v167_v6  ;;  %vm211_vm7 = vweird.f32 %v204_v7 }
  0x38   :  { %259 = vrsqrt.f32 %v204_v7 }
  0x3b   :  { %v254_v8 = vpop.eup %253 }
  0x3c   :  { %v256_v9 = vpop.eup %255  ;;  %v95_v10 = vmul.f32 %v254_v8, %v93_v2  ;;  %vm101_vm1 = vweird.f32 %v254_v8 }
  0x3d   :  { %v258_v11 = vpop.eup %257  ;;  %v132_v12 = vmul.f32 %v256_v9, %v130_v3  ;;  %vm138_vm3 = vweird.f32 %v256_v9  ;;  %vm447_vm6 = vmor %vm100_vm0, %vm101_vm1 }
  0x3e   :  { %v260_v13 = vpop.eup %259  ;;  %v96_v14 = vmul.f32 %v254_v8, %v95_v10  ;;  %v169_v15 = vmul.f32 %v258_v11, %v167_v6  ;;  %vm175_vm5 = vweird.f32 %v258_v11  ;;  %vm139_vm9 = vmor %vm137_vm2, %vm138_vm3 }
  0x3f   :  { %v133_v16 = vmul.f32 %v256_v9, %v132_v12  ;;  %v206_v17 = vmul.f32 %v260_v13, %v204_v7  ;;  %vm212_vm8 = vweird.f32 %v260_v13  ;;  %vm176_vm10 = vmor %vm174_vm4, %vm175_vm5 }
  0x40   :  { %v97_v18 = vmul.f32 0.5, %v96_v14  ;;  %v170_v19 = vmul.f32 %v258_v11, %v169_v15  ;;  %vm213_vm11 = vmor %vm211_vm7, %vm212_vm8 }
  0x41   :  { %v134_v20 = vmul.f32 0.5, %v133_v16  ;;  %v207_v21 = vmul.f32 %v260_v13, %v206_v17 }
  0x42   :  { %v98_v22 = vsub.f32 1.5, %v97_v18  ;;  %v171_v23 = vmul.f32 0.5, %v170_v19 }
  0x43   :  { %v135_v25 = vsub.f32 1.5, %v134_v20  ;;  %v208_v26 = vmul.f32 0.5, %v207_v21 }
  0x44   :  { %v99_v27 = vmul.f32 %v254_v8, %v98_v22  ;;  %v172_v29 = vsub.f32 1.5, %v171_v23 }
  0x45   :  { %v136_v32 = vmul.f32 %v256_v9, %v135_v25  ;;  %v209_v34 = vsub.f32 1.5, %v208_v26 }
  0x46   :  { %v103_v35 = vsel %vm447_vm6, %v254_v8, %v99_v27  ;;  %v173_v38 = vmul.f32 %v258_v11, %v172_v29 }
  0x47   :  { %v105_v40 = vmul.f32 %v104_v28, %v103_v35  ;;  %v140_v41 = vsel %vm139_vm9, %v256_v9, %v136_v32  ;;  %v210_v42 = vmul.f32 %v260_v13, %v209_v34 }
  0x48   :  { %v142_v44 = vmul.f32 %v141_v33, %v140_v41  ;;  %v177_v45 = vsel %vm176_vm10, %v258_v11, %v173_v38 }
  0x49   :  { %v107_v46 = vperm.slane %v105_v40, 0  ;;  %v179_v48 = vmul.f32 %v178_v39, %v177_v45  ;;  %v214_v49 = vsel %vm213_vm11, %v260_v13, %v210_v42 }
  0x4a   :  { %v144_v50 = vperm.slane %v142_v44, 0  ;;  %v216_v52 = vmul.f32 %v215_v43, %v214_v49 }
  0x4b   :  { %v108_v53 = vmul.f32 %v107_v46, %v431_v30  ;;  %v181_v54 = vperm.slane %v179_v48, 0 }
  0x4c   :  { %v145_v56 = vmul.f32 %v144_v50, %v433_v31  ;;  %v218_v57 = vperm.slane %v216_v52, 0 }
  0x4d   :  { %v112_v59 = vadd.f32 %v249_v47, %v108_v53  ;;  %v182_v60 = vmul.f32 %v181_v54, %v439_v36 }
  0x4e   :  { %v149_v61 = vadd.f32 %v250_v51, %v145_v56  ;;  %v219_v62 = vmul.f32 %v218_v57, %v441_v37 }
  0x4f   :  { %113 = vst [vmem:[#allocation10] sm:$0xff] %v112_v59  ;;  %v186_v30 = vadd.f32 %v251_v55, %v182_v60 }
  0x50   :  { %150 = vst [vmem:[#allocation10 + $0x8] sm:$0xff] %v149_v61  ;;  %v223_v63 = vadd.f32 %v252_v58, %v219_v62 }
  0x51   :  { %187 = vst [vmem:[#allocation10 + $0x10] sm:$0xff] %v186_v30 }
  0x52   :  { %224 = vst [vmem:[#allocation10 + $0x18] sm:$0xff] %v223_v63 }
  0x53   :  { %235 = dma.vmem_to_hbm [thread:$0]  %s231_s3, 512, %s233_s9, [#allocation4]  }
  0x54   :  { %387 = dma.done.wait [#allocation4], 512  }
  0x55   :  { %388 = vsyncadd [#allocation4], 4294966784 }
  0x56   :  { %240 = vsyncpa [#allocation3], 1 }
  0x57   :  { %241 = vsyncpa [#allocation6], 1 }
  0x58   :  { %242 = vsyncpa [#allocation9], 1 }
  0x59   :  { %243 = vsyncpa [#allocation4], 1 }

</bundles_post_ra>
